<compile_context>
chip_gen: v6e
topology: v6e:2x2x1
jax: 0.10.0
libtpu: 0.0.40
codegen_flags: <defaults>
</compile_context>

<pallas_src>
import jax
import jax.numpy as jnp
from jax.experimental import pallas as pl
from jax.experimental.pallas import tpu as pltpu

# ---- layout constants (safe on v5e / v6e / v7x) ----
H_PAD = 128                  # encoder feature dim, padded lane-dense
C_PAD = 128                  # num classes, padded lane-dense
TM_MAX = 256                 # max batch tile (MXU rows well fed)
TK_MAX = 2048                # max D_in reduction tile (f32 x tile = TM*TK*4 B)
RESIDENT_W1_LIMIT = 24 << 20  # keep resident bf16 w1 under ~24 MiB (v7x: 64 MiB VMEM)


def _round_up(x, m):
    return (x + m - 1) // m * m


def _pick_tm(batch):
    b16 = _round_up(max(batch, 1), 16)
    if b16 <= 16:
        return 16
    # Cap at TM_MAX and keep >=2 batch tiles so dimension_semantics=("parallel",...)
    # can shard the batch axis across v7x's two TensorCores.
    return min(TM_MAX, _round_up(pl.cdiv(b16, 2), 16))


def _make_kernel(num_classes, tk, w1_resident):
    def kernel(x_ref, w1_ref, b1_ref, w2_ref, b2_ref, lab_ref,
               logits_ref, nll_ref, feat_acc):
        k = pl.program_id(1)

        @pl.when(k == 0)
        def _():
            feat_acc[...] = jnp.zeros_like(feat_acc)

        # ---- encoder matmul: bf16 operands (x cast in-kernel), f32 MXU acc ----
        x_bf = x_ref[...].astype(jnp.bfloat16)
        if w1_resident:
            off = pl.multiple_of(k * tk, 128)
            w1_blk = w1_ref[pl.ds(off, tk), :]      # slice the VMEM-resident w1
        else:
            w1_blk = w1_ref[...]                    # k-tiled streamed w1
        feat_acc[...] += jnp.dot(x_bf, w1_blk, preferred_element_type=jnp.float32)

        @pl.when(k == pl.num_programs(1) - 1)
        def _():
            # epilogue stays f32 (v5e VPU/EUP have no bf16)
            feat = jnp.maximum(feat_acc[...] + b1_ref[...], 0.0)

            # ---- classification head: bf16 operands, single 128x128 MXU op ----
            logits = jnp.dot(feat.astype(jnp.bfloat16), w2_ref[...],
                             preferred_element_type=jnp.float32) + b2_ref[...]
            logits_ref[...] = logits

            # ---- CrossEntropyLoss epilogue (numerically stable, masked) ----
            col = jax.lax.broadcasted_iota(jnp.int32, logits.shape, 1)
            z = jnp.where(col < num_classes, logits, -1e30)   # mask padded classes
            m = jnp.max(z, axis=-1, keepdims=True)
            lse = m + jnp.log(jnp.sum(jnp.exp(z - m), axis=-1, keepdims=True))

            lab = lab_ref[...]                                 # (TM, 1) int32
            picked = jnp.sum(jnp.where(col == lab, logits, 0.0),
                             axis=-1, keepdims=True)
            valid = (lab >= 0).astype(jnp.float32)             # padded rows -> 0
            # TODO(synk): PyTorch ignore_index=-100 rows would also need to be
            # excluded from the mean denominator; here only batch-padding rows
            # are negative, so the wrapper's divide-by-B matches CrossEntropyLoss.
            nll = (lse - picked) * valid                       # (TM, 1)

            # per-batch-tile partial sum -> one lane-dense (8,128) slab
            tile_sum = jnp.sum(nll, axis=0, keepdims=True)     # (1, 1)
            nll_ref[...] = jnp.broadcast_to(tile_sum, nll_ref.shape)

    return kernel


def image_supervise_loss(pixel_values, labels, w1, b1, w2, b2):
    """Pallas-backed ImageSuperviseLoss forward: returns (loss_scalar, logits)."""
    B = pixel_values.shape[0]
    x_flat = pixel_values.reshape(B, -1).astype(jnp.float32)
    D_in = x_flat.shape[1]
    D_feat, num_classes = w2.shape
    assert D_feat <= H_PAD, f"D_feat={D_feat} must be <= {H_PAD}"
    assert num_classes <= C_PAD, f"num_classes={num_classes} must be <= {C_PAD}"

    TM = _pick_tm(B)
    B_pad = _round_up(B, TM)

    D_in_128 = _round_up(D_in, 128)
    if D_in_128 <= TK_MAX:
        TK = D_in_128
        D_in_pad = D_in_128
    else:
        TK = TK_MAX
        D_in_pad = _round_up(D_in_128, TK)

    n_i = B_pad // TM
    n_k = D_in_pad // TK

    # ---- x stays f32 (no padded bf16 HBM copy); pad only where required ----
    if B_pad == B and D_in_pad == D_in:
        x_p = x_flat
    else:
        x_p = jnp.zeros((B_pad, D_in_pad), jnp.float32).at[:B, :D_in].set(x_flat)

    # parameters: lane-dense padded; bf16 for both MXU operand streams
    w1_p = jnp.zeros((D_in_pad, H_PAD), jnp.bfloat16).at[:D_in, :D_feat].set(
        w1.astype(jnp.bfloat16))
    b1_p = jnp.zeros((1, H_PAD), jnp.float32).at[0, :D_feat].set(
        b1.astype(jnp.float32))
    w2_p = jnp.zeros((H_PAD, C_PAD), jnp.bfloat16).at[:D_feat, :num_classes].set(
        w2.astype(jnp.bfloat16))
    b2_p = jnp.zeros((1, C_PAD), jnp.float32).at[0, :num_classes].set(
        b2.astype(jnp.float32))
    lab_p = jnp.full((B_pad, 1), -1, jnp.int32).at[:B, 0].set(
        labels.astype(jnp.int32))

    # w1 residency: DMA once, keep in VMEM across the whole grid (constant
    # index_map); fall back to k-tiled streaming when it would not fit v7x.
    w1_bytes = D_in_pad * H_PAD * 2
    w1_resident = w1_bytes <= RESIDENT_W1_LIMIT
    if w1_resident:
        w1_spec = pl.BlockSpec((D_in_pad, H_PAD), lambda i, k: (0, 0))
    else:
        w1_spec = pl.BlockSpec((TK, H_PAD), lambda i, k: (k, 0))

    grid = (n_i, n_k)

    # VMEM budget: resident/streamed w1 + double-buffered f32 x tile + outputs
    x_tile_bytes = TM * TK * 4
    vmem_need = ((w1_bytes if w1_resident else 2 * TK * H_PAD * 2)
                 + 2 * x_tile_bytes
                 + 2 * TM * C_PAD * 4            # logits output buffers
                 + 2 * 8 * C_PAD * 4             # nll partial-sum buffers
                 + TM * H_PAD * 4                # feat accumulator scratch
                 + H_PAD * C_PAD * 2             # w2
                 + (H_PAD + C_PAD) * 4 + 2 * TM * 4)
    vmem_limit = int(min(max(2 * vmem_need, 32 << 20), 64 << 20))

    w1_reads = 1 if w1_resident else n_i
    flops = 2 * B_pad * D_in_pad * H_PAD + 2 * B_pad * H_PAD * C_PAD
    bytes_accessed = (x_p.size * 4 + w1_p.size * 2 * w1_reads
                      + w2_p.size * 2 + (b1_p.size + b2_p.size) * 4
                      + lab_p.size * 4
                      + B_pad * C_PAD * 4 + n_i * 8 * C_PAD * 4)
    cost = pl.CostEstimate(flops=flops, transcendentals=B_pad * C_PAD,
                           bytes_accessed=bytes_accessed)

    logits_pad, nll_part = pl.pallas_call(
        _make_kernel(num_classes, TK, w1_resident),
        out_shape=(jax.ShapeDtypeStruct((B_pad, C_PAD), jnp.float32),
                   jax.ShapeDtypeStruct((n_i * 8, C_PAD), jnp.float32)),
        grid_spec=pltpu.PrefetchScalarGridSpec(
            num_scalar_prefetch=0,
            grid=grid,
            in_specs=[
                pl.BlockSpec((TM, TK), lambda i, k: (i, k)),        # x (f32)
                w1_spec,                                            # w1 (bf16)
                pl.BlockSpec((1, H_PAD), lambda i, k: (0, 0)),      # b1
                pl.BlockSpec((H_PAD, C_PAD), lambda i, k: (0, 0)),  # w2 (bf16)
                pl.BlockSpec((1, C_PAD), lambda i, k: (0, 0)),      # b2
                pl.BlockSpec((TM, 1), lambda i, k: (i, 0)),         # int labels
            ],
            out_specs=(
                pl.BlockSpec((TM, C_PAD), lambda i, k: (i, 0)),     # logits
                pl.BlockSpec((8, C_PAD), lambda i, k: (i, 0)),      # nll partial
            ),
            scratch_shapes=[pltpu.VMEM((TM, H_PAD), jnp.float32)],
        ),
        compiler_params=pltpu.CompilerParams(
            dimension_semantics=("parallel", "arbitrary"),
            vmem_limit_bytes=vmem_limit),
        cost_estimate=cost,
    )(x_p, w1_p, b1_p, w2_p, b2_p, lab_p)

    logits = logits_pad[:B, :num_classes]
    loss = jnp.sum(nll_part[::8, 0]) / B      # CrossEntropyLoss mean reduction
    return loss, logits


if __name__ == "__main__":
    # Small shapes consistent with the module's forward.
    B, C, H, W = 2, 4, 16, 16          # pixel_values: NCHW
    D_in = C * H * W                   # 1024
    D_feat = 32                        # synthetic encoder feature dim
    NUM_CLASSES = 8                    # multiclass mode -> CrossEntropyLoss

    key = jax.random.PRNGKey(0)
    k_x, k_y, k_w1, k_b1, k_w2, k_b2 = jax.random.split(key, 6)

    pixel_values = jax.random.normal(k_x, (B, C, H, W), dtype=jnp.float32)
    labels = jax.random.randint(k_y, (B,), 0, NUM_CLASSES, dtype=jnp.int32)

    # Deterministic synthetic parameters (encoder projection + classifier head).
    w1 = jax.random.normal(k_w1, (D_in, D_feat), dtype=jnp.float32) * 0.02
    b1 = jax.random.normal(k_b1, (D_feat,), dtype=jnp.float32) * 0.01
    w2 = jax.random.normal(k_w2, (D_feat, NUM_CLASSES), dtype=jnp.float32) * 0.02
    b2 = jax.random.normal(k_b2, (NUM_CLASSES,), dtype=jnp.float32) * 0.01

    loss, logits = jax.jit(image_supervise_loss)(
        pixel_values, labels, w1, b1, w2, b2)
    jax.block_until_ready((loss, logits))

    # Reference with the same bf16 operand casts (f32 accumulation).
    x_flat = pixel_values.reshape(B, -1)
    feat_ref = jnp.maximum(
        jnp.dot(x_flat.astype(jnp.bfloat16), w1.astype(jnp.bfloat16),
                preferred_element_type=jnp.float32) + b1, 0.0)
    ref_logits = jnp.dot(feat_ref.astype(jnp.bfloat16), w2.astype(jnp.bfloat16),
                         preferred_element_type=jnp.float32) + b2
    ref_loss = jnp.mean(
        jax.nn.logsumexp(ref_logits, axis=-1)
        - jnp.take_along_axis(ref_logits, labels[:, None], axis=-1)[:, 0])
    assert jnp.allclose(logits, ref_logits, atol=5e-3), (logits, ref_logits)
    assert jnp.allclose(loss, ref_loss, atol=5e-3), (loss, ref_loss)

    # Loose sanity check vs full-f32 math (bf16 operands change numerics slightly).
    feat32 = jnp.maximum(x_flat @ w1 + b1, 0.0)
    logits32 = feat32 @ w2 + b2
    loss32 = jnp.mean(
        jax.nn.logsumexp(logits32, axis=-1)
        - jnp.take_along_axis(logits32, labels[:, None], axis=-1)[:, 0])
    assert jnp.allclose(loss, loss32, atol=5e-2), (loss, loss32)

    # TODO(synk): mixup_data / mixup_criterion use host-side RNG (np.random.beta,
    # torch.randperm) and are not part of forward(); not implemented in-kernel.
    print("KERNEL_OK")
</pallas_src>

<mosaic_0001>
module attributes {stable_mosaic.version = 11 : i64} {
  func.func @kernel(%arg0: i32, %arg1: i32, %arg2: memref<16x1024xf32, #tpu.memory_space<vmem>>, %arg3: memref<1024x128xbf16, #tpu.memory_space<vmem>>, %arg4: memref<1x128xf32, #tpu.memory_space<vmem>>, %arg5: memref<128x128xbf16, #tpu.memory_space<vmem>>, %arg6: memref<1x128xf32, #tpu.memory_space<vmem>>, %arg7: memref<16x1xi32, #tpu.memory_space<vmem>>, %arg8: memref<16x128xf32, #tpu.memory_space<vmem>>, %arg9: memref<8x128xf32, #tpu.memory_space<vmem>>, %arg10: memref<16x128xf32, #tpu.memory_space<vmem>>) attributes {dimension_semantics = [#tpu.dimension_semantics<parallel>, #tpu.dimension_semantics<arbitrary>], iteration_bounds = array<i64: 1, 1>, scalar_prefetch = 0 : i64, scratch_operands = 1 : i64, tpu.core_type = #tpu.core_type<tc>, window_params = [{transform_indices = @transform_0, window_bounds = array<i64: 16, 1024>}, {pipeline_mode = #tpu.pipeline_mode<synchronous>, transform_indices = @transform_1, window_bounds = array<i64: 1024, 128>}, {pipeline_mode = #tpu.pipeline_mode<synchronous>, transform_indices = @transform_2, window_bounds = array<i64: 1, 128>}, {pipeline_mode = #tpu.pipeline_mode<synchronous>, transform_indices = @transform_3, window_bounds = array<i64: 128, 128>}, {pipeline_mode = #tpu.pipeline_mode<synchronous>, transform_indices = @transform_4, window_bounds = array<i64: 1, 128>}, {transform_indices = @transform_5, window_bounds = array<i64: 16, 1>}, {transform_indices = @transform_6, window_bounds = array<i64: 16, 128>}, {transform_indices = @transform_7, window_bounds = array<i64: 8, 128>}]} {
    %c0_i32 = arith.constant 0 : i32
    %0 = arith.cmpi eq, %arg1, %c0_i32 : i32
    %1 = arith.extui %0 : i1 to i32
    %c0_i32_0 = arith.constant 0 : i32
    %2 = arith.cmpi ne, %1, %c0_i32_0 : i32
    scf.if %2 {
      %cst_9 = arith.constant 0.000000e+00 : f32
      %16 = vector.broadcast %cst_9 : f32 to vector<16x128xf32>
      %c0_10 = arith.constant 0 : index
      %c0_11 = arith.constant 0 : index
      %17 = vector.load %arg10[%c0_10, %c0_11] : memref<16x128xf32, #tpu.memory_space<vmem>>, vector<16x128xf32>
      tpu.vector_store %arg10[%c0_10, %c0_11], %16 {strides = array<i32>} : memref<16x128xf32, #tpu.memory_space<vmem>>, vector<16x128xf32>,
    } else {
    }
    %c0 = arith.constant 0 : index
    %c0_1 = arith.constant 0 : index
    %3 = vector.load %arg2[%c0, %c0_1] : memref<16x1024xf32, #tpu.memory_space<vmem>>, vector<16x1024xf32>
    %4 = arith.truncf %3 : vector<16x1024xf32> to vector<16x1024xbf16>
    %c1024_i32 = arith.constant 1024 : i32
    %5 = arith.muli %arg1, %c1024_i32 : i32
    %6 = tpu.assume_multiple %5, 128 : i32
    %7 = arith.index_cast %6 : i32 to index
    %c0_2 = arith.constant 0 : index
    %8 = vector.load %arg3[%7, %c0_2] : memref<1024x128xbf16, #tpu.memory_space<vmem>>, vector<1024x128xbf16>
    %c0_3 = arith.constant 0 : index
    %c0_4 = arith.constant 0 : index
    %9 = vector.load %arg10[%c0_3, %c0_4] : memref<16x128xf32, #tpu.memory_space<vmem>>, vector<16x128xf32>
    %cst = arith.constant dense<0.000000e+00> : vector<16x128xf32>
    %10 = tpu.matmul %4, %8, %cst {dimension_numbers = #tpu.dot_dimension_numbers<[1], [0], [0], [1], [0, 0, 1, 1], [], []>} : vector<16x1024xbf16>, vector<1024x128xbf16>, vector<16x128xf32> -> vector<16x128xf32>
    %11 = arith.addf %9, %10 : vector<16x128xf32>
    %c0_5 = arith.constant 0 : index
    %c0_6 = arith.constant 0 : index
    %12 = vector.load %arg10[%c0_5, %c0_6] : memref<16x128xf32, #tpu.memory_space<vmem>>, vector<16x128xf32>
    tpu.vector_store %arg10[%c0_5, %c0_6], %11 {strides = array<i32>} : memref<16x128xf32, #tpu.memory_space<vmem>>, vector<16x128xf32>,
    %c0_i32_7 = arith.constant 0 : i32
    %13 = arith.cmpi eq, %arg1, %c0_i32_7 : i32
    %14 = arith.extui %13 : i1 to i32
    %c0_i32_8 = arith.constant 0 : i32
    %15 = arith.cmpi ne, %14, %c0_i32_8 : i32
    scf.if %15 {
      %c0_9 = arith.constant 0 : index
      %c0_10 = arith.constant 0 : index
      %16 = vector.load %arg10[%c0_9, %c0_10] : memref<16x128xf32, #tpu.memory_space<vmem>>, vector<16x128xf32>
      %c0_11 = arith.constant 0 : index
      %c0_12 = arith.constant 0 : index
      %17 = vector.load %arg4[%c0_11, %c0_12] : memref<1x128xf32, #tpu.memory_space<vmem>>, vector<1x128xf32>
      %18 = vector.broadcast %17 : vector<1x128xf32> to vector<16x128xf32>
      %19 = arith.addf %16, %18 : vector<16x128xf32>
      %cst_13 = arith.constant 0.000000e+00 : f32
      %20 = vector.broadcast %cst_13 : f32 to vector<16x128xf32>
      %21 = arith.maximumf %19, %20 : vector<16x128xf32>
      %22 = arith.truncf %21 : vector<16x128xf32> to vector<16x128xbf16>
      %c0_14 = arith.constant 0 : index
      %c0_15 = arith.constant 0 : index
      %23 = vector.load %arg5[%c0_14, %c0_15] : memref<128x128xbf16, #tpu.memory_space<vmem>>, vector<128x128xbf16>
      %cst_16 = arith.constant dense<0.000000e+00> : vector<16x128xf32>
      %24 = tpu.matmul %22, %23, %cst_16 {dimension_numbers = #tpu.dot_dimension_numbers<[1], [0], [0], [1], [0, 0, 1, 1], [], []>} : vector<16x128xbf16>, vector<128x128xbf16>, vector<16x128xf32> -> vector<16x128xf32>
      %c0_17 = arith.constant 0 : index
      %c0_18 = arith.constant 0 : index
      %25 = vector.load %arg6[%c0_17, %c0_18] : memref<1x128xf32, #tpu.memory_space<vmem>>, vector<1x128xf32>
      %26 = vector.broadcast %25 : vector<1x128xf32> to vector<16x128xf32>
      %27 = arith.addf %24, %26 : vector<16x128xf32>
      %c0_19 = arith.constant 0 : index
      %c0_20 = arith.constant 0 : index
      %28 = vector.load %arg8[%c0_19, %c0_20] : memref<16x128xf32, #tpu.memory_space<vmem>>, vector<16x128xf32>
      tpu.vector_store %arg8[%c0_19, %c0_20], %27 {strides = array<i32>} : memref<16x128xf32, #tpu.memory_space<vmem>>, vector<16x128xf32>,
      %29 = tpu.iota {dimensions = array<i32: 1>} : vector<16x128xi32>
      %c8_i32 = arith.constant 8 : i32
      %30 = vector.broadcast %c8_i32 : i32 to vector<16x128xi32>
      %31 = arith.cmpi slt, %29, %30 : vector<16x128xi32>
      %cst_21 = arith.constant -1.000000e+30 : f32
      %32 = vector.broadcast %cst_21 : f32 to vector<16x128xf32>
      %33 = arith.select %31, %27, %32 : vector<16x128xi1>, vector<16x128xf32>
      %cst_22 = arith.constant dense<0xFF800000> : vector<16xf32>
      %34 = vector.multi_reduction <maximumf>, %33, %cst_22 [1] : vector<16x128xf32> to vector<16xf32>
      %35 = vector.shape_cast %34 : vector<16xf32> to vector<16x1xf32>
      %36 = vector.broadcast %35 : vector<16x1xf32> to vector<16x128xf32>
      %37 = arith.subf %33, %36 : vector<16x128xf32>
      %38 = math.exp %37 : vector<16x128xf32>
      %cst_23 = arith.constant dense<0.000000e+00> : vector<16xf32>
      %39 = vector.multi_reduction <add>, %38, %cst_23 [1] : vector<16x128xf32> to vector<16xf32>
      %40 = vector.shape_cast %39 : vector<16xf32> to vector<16x1xf32>
      %41 = math.log %40 : vector<16x1xf32>
      %42 = arith.addf %35, %41 : vector<16x1xf32>
      %c0_24 = arith.constant 0 : index
      %c0_25 = arith.constant 0 : index
      %43 = vector.load %arg7[%c0_24, %c0_25] : memref<16x1xi32, #tpu.memory_space<vmem>>, vector<16x1xi32>
      %44 = vector.broadcast %43 : vector<16x1xi32> to vector<16x128xi32>
      %45 = arith.cmpi eq, %29, %44 : vector<16x128xi32>
      %cst_26 = arith.constant 0.000000e+00 : f32
      %46 = vector.broadcast %cst_26 : f32 to vector<16x128xf32>
      %47 = arith.select %45, %27, %46 : vector<16x128xi1>, vector<16x128xf32>
      %cst_27 = arith.constant dense<0.000000e+00> : vector<16xf32>
      %48 = vector.multi_reduction <add>, %47, %cst_27 [1] : vector<16x128xf32> to vector<16xf32>
      %49 = vector.shape_cast %48 : vector<16xf32> to vector<16x1xf32>
      %c0_i32_28 = arith.constant 0 : i32
      %50 = vector.broadcast %c0_i32_28 : i32 to vector<16x1xi32>
      %51 = arith.cmpi sge, %43, %50 : vector<16x1xi32>
      %52 = arith.extui %51 : vector<16x1xi1> to vector<16x1xi32>
      %53 = arith.sitofp %52 : vector<16x1xi32> to vector<16x1xf32>
      %54 = arith.subf %42, %49 : vector<16x1xf32>
      %55 = arith.mulf %54, %53 : vector<16x1xf32>
      %cst_29 = arith.constant dense<0.000000e+00> : vector<1xf32>
      %56 = vector.multi_reduction <add>, %55, %cst_29 [0] : vector<16x1xf32> to vector<1xf32>
      %57 = vector.shape_cast %56 : vector<1xf32> to vector<1x1xf32>
      %58 = vector.shape_cast %57 : vector<1x1xf32> to vector<1x1xf32>
      %59 = vector.broadcast %58 : vector<1x1xf32> to vector<8x128xf32>
      %c0_30 = arith.constant 0 : index
      %c0_31 = arith.constant 0 : index
      %60 = vector.load %arg9[%c0_30, %c0_31] : memref<8x128xf32, #tpu.memory_space<vmem>>, vector<8x128xf32>
      tpu.vector_store %arg9[%c0_30, %c0_31], %59 {strides = array<i32>} : memref<8x128xf32, #tpu.memory_space<vmem>>, vector<8x128xf32>,
    } else {
    }
    return
  }
  func.func @transform_0(%arg0: i32, %arg1: i32) -> (i32, i32) {
    %c0_i32 = arith.constant 0 : i32
    return %arg0, %arg1 : i32, i32
  }
  func.func @transform_1(%arg0: i32, %arg1: i32) -> (i32, i32) {
    %c0_i32 = arith.constant 0 : i32
    %c0_i32_0 = arith.constant 0 : i32
    %c0_i32_1 = arith.constant 0 : i32
    return %c0_i32, %c0_i32_0 : i32, i32
  }
  func.func @transform_2(%arg0: i32, %arg1: i32) -> (i32, i32) {
    %c0_i32 = arith.constant 0 : i32
    %c0_i32_0 = arith.constant 0 : i32
    %c0_i32_1 = arith.constant 0 : i32
    return %c0_i32, %c0_i32_0 : i32, i32
  }
  func.func @transform_3(%arg0: i32, %arg1: i32) -> (i32, i32) {
    %c0_i32 = arith.constant 0 : i32
    %c0_i32_0 = arith.constant 0 : i32
    %c0_i32_1 = arith.constant 0 : i32
    return %c0_i32, %c0_i32_0 : i32, i32
  }
  func.func @transform_4(%arg0: i32, %arg1: i32) -> (i32, i32) {
    %c0_i32 = arith.constant 0 : i32
    %c0_i32_0 = arith.constant 0 : i32
    %c0_i32_1 = arith.constant 0 : i32
    return %c0_i32, %c0_i32_0 : i32, i32
  }
  func.func @transform_5(%arg0: i32, %arg1: i32) -> (i32, i32) {
    %c0_i32 = arith.constant 0 : i32
    %c0_i32_0 = arith.constant 0 : i32
    return %arg0, %c0_i32 : i32, i32
  }
  func.func @transform_6(%arg0: i32, %arg1: i32) -> (i32, i32) {
    %c0_i32 = arith.constant 0 : i32
    %c0_i32_0 = arith.constant 0 : i32
    return %arg0, %c0_i32 : i32, i32
  }
  func.func @transform_7(%arg0: i32, %arg1: i32) -> (i32, i32) {
    %c0_i32 = arith.constant 0 : i32
    %c0_i32_0 = arith.constant 0 : i32
    return %arg0, %c0_i32 : i32, i32
  }
}

</mosaic_0001>

<bundles_post_ra>
// kernel: image_supervise_loss.1
= control target key start
LH: loop header
LB: loop body
LE: loop exit
PB: predicated region body
PF: predicated region fallthrough
CT: control target
= control target key end

     0   :  { %vm1230_vm0 = vmmov 0   ;;  %vm925_vm6 = vcmask 7168   ;;  %s1576_s1 = inlined_call_operand.vmem [shape: bf16[1024,128], index: 1, kind: input, shape index: {}]   ;;  %s1577_s0 = inlined_call_operand.vmem [shape: f32[16,1024], index: 0, kind: input, shape index: {}]   ;;  %s1578_s3 = inlined_call_operand.vmem [shape: bf16[128,128], index: 3, kind: input, shape index: {}]   ;;  %s1579_s5 = inlined_call_operand.vmem [shape: s32[16,1], index: 5, kind: input, shape index: {}]   ;;  %s1580_s2 = inlined_call_operand.vmem [shape: f32[1,128], index: 2, kind: input, shape index: {}]   ;;  %s1581_s4 = inlined_call_operand.vmem [shape: f32[1,128], index: 4, kind: input, shape index: {}]   ;;  %s1582_s6 = inlined_call_operand.vmem [shape: f32[16,128], index: 6, kind: output, shape index: {0}]   ;;  %s1583_s7 = inlined_call_operand.vmem [shape: f32[8,128], index: 7, kind: output, shape index: {1}]  }
   0x1   :  { %v1149_v0 = vld [vmem:[%s1576_s1 + $0x78] sm:$0xff]   ;;  %v1153_v4 = vld [vmem:[%s1576_s1 + $0x70] sm:$0xff]   ;;  %v1157_v8 = vld [vmem:[%s1576_s1 + $0x68] sm:$0xff]  }
   0x2   :  { %v1150_v1 = vld [vmem:[%s1576_s1 + $0xf8] sm:$0xff]   ;;  %1027 = vmatprep.subr.bf16.mxu0 %v1149_v0  ;;  %v1154_v5 = vld [vmem:[%s1576_s1 + $0xf0] sm:$0xff]   ;;  %v1158_v9 = vld [vmem:[%s1576_s1 + $0xe8] sm:$0xff]  }
   0x3   :  { %v1151_v2 = vld [vmem:[%s1576_s1 + $0x38] sm:$0xff]   ;;  %1049 = vmatprep.subr.bf16.mxu1 %v1150_v1  ;;  %v1155_v6 = vld [vmem:[%s1576_s1 + $0x30] sm:$0xff]   ;;  %v1159_v10 = vld [vmem:[%s1576_s1 + $0x28] sm:$0xff]  }
   0x4   :  { %v1152_v3 = vld [vmem:[%s1576_s1 + $0xb8] sm:$0xff]   ;;  %1028 = vmatpush3.bf16.msra.mxu0 %v1151_v2  ;;  %v1156_v7 = vld [vmem:[%s1576_s1 + $0xb0] sm:$0xff]   ;;  %v1160_v11 = vld [vmem:[%s1576_s1 + $0xa8] sm:$0xff]  }
   0x5   :  { %1050 = vmatpush3.bf16.msra.mxu1 %v1152_v3  ;;  %1029 = vmatprep.subr.bf16.mxu0 %v1153_v4  ;;  %v1161_v12 = vld [vmem:[%s1576_s1 + $0x60] sm:$0xff]   ;;  %v1165_v16 = vld [vmem:[%s1576_s1 + $0x58] sm:$0xff]   ;;  %v1169_v20 = vld [vmem:[%s1576_s1 + $0x50] sm:$0xff]  }
   0x6   :  { %1051 = vmatprep.subr.bf16.mxu1 %v1154_v5  ;;  %v1162_v13 = vld [vmem:[%s1576_s1 + $0xe0] sm:$0xff]   ;;  %v1166_v17 = vld [vmem:[%s1576_s1 + $0xd8] sm:$0xff]   ;;  %v1170_v21 = vld [vmem:[%s1576_s1 + $0xd0] sm:$0xff]  }
   0x7   :  { %v1163_v14 = vld [vmem:[%s1576_s1 + $0x20] sm:$0xff]   ;;  %v1167_v18 = vld [vmem:[%s1576_s1 + $0x18] sm:$0xff]   ;;  %v1171_v22 = vld [vmem:[%s1576_s1 + $0x10] sm:$0xff]  }
   0x8   :  { %1030 = vmatpush3.bf16.msra.mxu0 %v1155_v6  ;;  %v1164_v15 = vld [vmem:[%s1576_s1 + $0xa0] sm:$0xff]   ;;  %v1168_v19 = vld [vmem:[%s1576_s1 + $0x98] sm:$0xff]   ;;  %v1172_v23 = vld [vmem:[%s1576_s1 + $0x90] sm:$0xff]  }
   0x9   :  { %1052 = vmatpush3.bf16.msra.mxu1 %v1156_v7  ;;  %1031 = vmatprep.subr.bf16.mxu0 %v1157_v8  ;;  %v1173_v24 = vld [vmem:[%s1576_s1 + $0x48] sm:$0xff]   ;;  %v1177_v28 = vld [vmem:[%s1576_s1 + $0x40] sm:$0xff]   ;;  %v35_v34 = vld [vmem:[%s1577_s0 + $0x18] sm:$0xff] }
   0xa   :  { %1053 = vmatprep.subr.bf16.mxu1 %v1158_v9  ;;  %v1174_v25 = vld [vmem:[%s1576_s1 + $0xc8] sm:$0xff]   ;;  %v1178_v29 = vld [vmem:[%s1576_s1 + $0xc0] sm:$0xff]   ;;  %v43_v36 = vld [vmem:[%s1577_s0 + $0x58] sm:$0xff] }
   0xb   :  { %v1175_v26 = vld [vmem:[%s1576_s1 + $0x8] sm:$0xff]   ;;  %v1179_v30 = vld [vmem:[%s1576_s1] sm:$0xff]   ;;  %v51_v39 = vpack.c.bf16 %v43_v36, %v35_v34  ;;  %v34_v41 = vld [vmem:[%s1577_s0 + $0x10] sm:$0xff] }
   0xc   :  { %1032 = vmatpush3.bf16.msra.mxu0 %v1159_v10  ;;  %v1176_v27 = vld [vmem:[%s1576_s1 + $0x88] sm:$0xff]   ;;  %v1180_v31 = vld [vmem:[%s1576_s1 + $0x80] sm:$0xff]   ;;  %v42_v42 = vld [vmem:[%s1577_s0 + $0x50] sm:$0xff] }
   0xd   :  { %1054 = vmatpush3.bf16.msra.mxu1 %v1160_v11  ;;  %1033 = vmatprep.subr.bf16.mxu0 %v1161_v12  ;;  %v33_v32 = vld [vmem:[%s1577_s0 + $0x8] sm:$0xff]  ;;  %v32_v37 = vld [vmem:[%s1577_s0] sm:$0xff]  ;;  %v50_v43 = vpack.c.bf16 %v42_v42, %v34_v41  ;;  %v1181_v44 = vld [vmem:[%s1576_s1 + $0x178] sm:$0xff]  }
   0xe   :  { %1055 = vmatprep.subr.bf16.mxu1 %v1162_v13  ;;  %v41_v33 = vld [vmem:[%s1577_s0 + $0x48] sm:$0xff]  ;;  %v40_v38 = vld [vmem:[%s1577_s0 + $0x40] sm:$0xff]  ;;  %648 = vmatprep.mubr.bf16.mxu1 %v51_v39  ;;  %v1182_v45 = vld [vmem:[%s1576_s1 + $0x1f8] sm:$0xff]  }
   0xf   :  { %v49_v35 = vpack.c.bf16 %v41_v33, %v33_v32  ;;  %v48_v40 = vpack.c.bf16 %v40_v38, %v32_v37  ;;  %v1183_v46 = vld [vmem:[%s1576_s1 + $0x138] sm:$0xff]   ;;  %v1185_v48 = vld [vmem:[%s1576_s1 + $0x170] sm:$0xff]   ;;  %v1189_v52 = vld [vmem:[%s1576_s1 + $0x168] sm:$0xff]   ;;  %v1231_v33 = vmov 0  }
  0x10   :  { %1034 = vmatpush3.bf16.msra.mxu0 %v1163_v14  ;;  %v1184_v47 = vld [vmem:[%s1576_s1 + $0x1b8] sm:$0xff]   ;;  %v1186_v49 = vld [vmem:[%s1576_s1 + $0x1f0] sm:$0xff]   ;;  %v1190_v53 = vld [vmem:[%s1576_s1 + $0x1e8] sm:$0xff]   ;;  %1147 = vset.pattern.permute.xlu1 %v1231_v33 }
  0x11   :  { %1056 = vmatpush3.bf16.msra.mxu1 %v1164_v15  ;;  %1035 = vmatprep.subr.bf16.mxu0 %v1165_v16  ;;  %v1187_v50 = vld [vmem:[%s1576_s1 + $0x130] sm:$0xff]   ;;  %v1191_v54 = vld [vmem:[%s1576_s1 + $0x128] sm:$0xff]   ;;  %v1193_v56 = vld [vmem:[%s1576_s1 + $0x160] sm:$0xff]  }
  0x12   :  { %1057 = vmatprep.subr.bf16.mxu1 %v1166_v17  ;;  %607 = vmatprep.mubr.bf16.mxu0 %v49_v35  ;;  %v1188_v51 = vld [vmem:[%s1576_s1 + $0x1b0] sm:$0xff]   ;;  %v1192_v55 = vld [vmem:[%s1576_s1 + $0x1a8] sm:$0xff]   ;;  %v1194_v57 = vld [vmem:[%s1576_s1 + $0x1e0] sm:$0xff]  }
  0x13   :  { %v1195_v58 = vld [vmem:[%s1576_s1 + $0x120] sm:$0xff]   ;;  %v1197_v60 = vld [vmem:[%s1576_s1 + $0x158] sm:$0xff]   ;;  %v1201_v0 = vld [vmem:[%s1576_s1 + $0x150] sm:$0xff]   ;;  %1148 = vset.pattern.permute.xlu0 %v1231_v33 }
  0x14   :  { %1036 = vmatpush3.bf16.msra.mxu0 %v1167_v18  ;;  %v1196_v59 = vld [vmem:[%s1576_s1 + $0x1a0] sm:$0xff]   ;;  %v1198_v61 = vld [vmem:[%s1576_s1 + $0x1d8] sm:$0xff]   ;;  %v1202_v1 = vld [vmem:[%s1576_s1 + $0x1d0] sm:$0xff]  }
  0x15   :  { %1058 = vmatpush3.bf16.msra.mxu1 %v1168_v19  ;;  %1037 = vmatprep.subr.bf16.mxu0 %v1169_v20  ;;  %v1199_v62 = vld [vmem:[%s1576_s1 + $0x118] sm:$0xff]   ;;  %v1203_v2 = vld [vmem:[%s1576_s1 + $0x110] sm:$0xff]   ;;  %v1205_v4 = vld [vmem:[%s1576_s1 + $0x148] sm:$0xff]  }
  0x16   :  { %1059 = vmatprep.subr.bf16.mxu1 %v1170_v21  ;;  %v1200_v63 = vld [vmem:[%s1576_s1 + $0x198] sm:$0xff]   ;;  %v1204_v3 = vld [vmem:[%s1576_s1 + $0x190] sm:$0xff]   ;;  %v1206_v5 = vld [vmem:[%s1576_s1 + $0x1c8] sm:$0xff]  }
  0x17   :  { %v1207_v6 = vld [vmem:[%s1576_s1 + $0x108] sm:$0xff]   ;;  %v1209_v8 = vld [vmem:[%s1576_s1 + $0x140] sm:$0xff]   ;;  %v39_v14 = vld [vmem:[%s1577_s0 + $0x38] sm:$0xff] }
  0x18   :  { %1038 = vmatpush3.bf16.msra.mxu0 %v1171_v22  ;;  %v1208_v7 = vld [vmem:[%s1576_s1 + $0x188] sm:$0xff]   ;;  %v1210_v9 = vld [vmem:[%s1576_s1 + $0x1c0] sm:$0xff]   ;;  %v47_v15 = vld [vmem:[%s1577_s0 + $0x78] sm:$0xff] }
  0x19   :  { %1060 = vmatpush3.bf16.msra.mxu1 %v1172_v23  ;;  %1039 = vmatprep.subr.bf16.mxu0 %v1173_v24  ;;  %v1211_v10 = vld [vmem:[%s1576_s1 + $0x100] sm:$0xff]   ;;  %v37_v12 = vld [vmem:[%s1577_s0 + $0x28] sm:$0xff]  ;;  %v55_v17 = vpack.c.bf16 %v47_v15, %v39_v14  ;;  %v38_v20 = vld [vmem:[%s1577_s0 + $0x30] sm:$0xff]  ;;  %v1229_v24 = vmov 0.0  }
  0x1a   :  { %1061 = vmatprep.subr.bf16.mxu1 %v1174_v25  ;;  %v1212_v11 = vld [vmem:[%s1576_s1 + $0x180] sm:$0xff]   ;;  %v45_v13 = vld [vmem:[%s1577_s0 + $0x68] sm:$0xff]  ;;  %v46_v22 = vld [vmem:[%s1577_s0 + $0x70] sm:$0xff] }
  0x1b   :  { %v53_v16 = vpack.c.bf16 %v45_v13, %v37_v12  ;;  %v36_v18 = vld [vmem:[%s1577_s0 + $0x20] sm:$0xff]  ;;  %v54_v23 = vpack.c.bf16 %v46_v22, %v38_v20  ;;  %v1213_v25 = vld [vmem:[%s1578_s3 + $0x38] sm:$0xff]   ;;  %v1554_v35 = vld [vmem:[%s1579_s5 + $0x8] sm:$0xff] }
  0x1c   :  { %1040 = vmatpush3.bf16.msra.mxu0 %v1175_v26  ;;  %v44_v19 = vld [vmem:[%s1577_s0 + $0x60] sm:$0xff]  ;;  %v1214_v26 = vld [vmem:[%s1578_s3 + $0x30] sm:$0xff]   ;;  %vm916_vm5 = vcmp.ge.s32.totalorder %v1554_v35, 0 }
  0x1d   :  { %1062 = vmatpush3.bf16.msra.mxu1 %v1176_v27  ;;  %1041 = vmatprep.subr.bf16.mxu0 %v1177_v28  ;;  %v52_v21 = vpack.c.bf16 %v44_v19, %v36_v18  ;;  %v1215_v27 = vld [vmem:[%s1578_s3 + $0x28] sm:$0xff]   ;;  %v1216_v28 = vld [vmem:[%s1578_s3 + $0x20] sm:$0xff]  }
  0x1e   :  { %1063 = vmatprep.subr.bf16.mxu1 %v1178_v29  ;;  %v1217_v29 = vld [vmem:[%s1578_s3 + $0x18] sm:$0xff]   ;;  %v1220_v32 = vld [vmem:[%s1578_s3] sm:$0xff]  }
  0x1f   :  { %v1548_v34 = vld [vmem:[%s1579_s5] sm:$0xff] }
  0x20   :  { %1042 = vmatpush3.bf16.msra.mxu0 %v1179_v30  ;;  %v1218_v30 = vld [vmem:[%s1578_s3 + $0x10] sm:$0xff]   ;;  %902 = vperm.xlu1 %1147, %v1548_v34   ;;  %vm915_vm4 = vcmp.ge.s32.totalorder %v1548_v34, 0 }
  0x21   :  { %1064 = vmatpush3.bf16.msra.mxu1 %v1180_v31  ;;  %1071 = vmatprep.subr.bf16.mxu0 %v1181_v44  ;;  %v1219_v31 = vld [vmem:[%s1578_s3 + $0x8] sm:$0xff]  }
  0x22   :  { %1093 = vmatprep.subr.bf16.mxu1 %v1182_v45 }
  0x23   :  { %608 = vmatmul.mubr.bf16.vlgmr.msra.gmra.mxu0 %v48_v40 }
  0x24   :  { %649 = vmatmul.mubr.bf16.vlgmr.msra.gmra.mxu1 %v50_v43  ;;  %1072 = vmatpush3.bf16.msra.mxu0 %v1183_v46 }
  0x25   :  { %1094 = vmatpush3.bf16.msra.mxu1 %v1184_v47  ;;  %1073 = vmatprep.subr.bf16.mxu0 %v1185_v48 }
  0x26   :  { %1095 = vmatprep.subr.bf16.mxu1 %v1186_v49  ;;  %689 = vmatprep.mubr.bf16.mxu0 %v53_v16 }
  0x27   :  { %730 = vmatprep.mubr.bf16.mxu1 %v55_v17  ;;  %905 = vperm.xlu1 %1147, %v1554_v35  }
  0x28   :  { %1074 = vmatpush3.bf16.msra.mxu0 %v1187_v50 }
  0x29   :  { %1096 = vmatpush3.bf16.msra.mxu1 %v1188_v51  ;;  %1075 = vmatprep.subr.bf16.mxu0 %v1189_v52 }
  0x2a   :  { %1097 = vmatprep.subr.bf16.mxu1 %v1190_v53 }
  0x2c   :  { %1076 = vmatpush3.bf16.msra.mxu0 %v1191_v54 }
  0x2d   :  { %1098 = vmatpush3.bf16.msra.mxu1 %v1192_v55  ;;  %1077 = vmatprep.subr.bf16.mxu0 %v1193_v56 }
  0x2e   :  { %1099 = vmatprep.subr.bf16.mxu1 %v1194_v57 }
  0x30   :  { %1078 = vmatpush3.bf16.msra.mxu0 %v1195_v58 }
  0x31   :  { %1100 = vmatpush3.bf16.msra.mxu1 %v1196_v59  ;;  %1079 = vmatprep.subr.bf16.mxu0 %v1197_v60 }
  0x32   :  { %1101 = vmatprep.subr.bf16.mxu1 %v1198_v61 }
  0x34   :  { %1080 = vmatpush3.bf16.msra.mxu0 %v1199_v62 }
  0x35   :  { %1102 = vmatpush3.bf16.msra.mxu1 %v1200_v63  ;;  %1081 = vmatprep.subr.bf16.mxu0 %v1201_v0  ;;  %v1015_v63 = vld [vmem:[%s1580_s2] ss:$0 sm:$0xff] }
  0x36   :  { %1103 = vmatprep.subr.bf16.mxu1 %v1202_v1 }
  0x38   :  { %1082 = vmatpush3.bf16.msra.mxu0 %v1203_v2 }
  0x39   :  { %1104 = vmatpush3.bf16.msra.mxu1 %v1204_v3  ;;  %1083 = vmatprep.subr.bf16.mxu0 %v1205_v4 }
  0x3a   :  { %1105 = vmatprep.subr.bf16.mxu1 %v1206_v5 }
  0x3c   :  { %1084 = vmatpush3.bf16.msra.mxu0 %v1207_v6 }
  0x3d   :  { %1106 = vmatpush3.bf16.msra.mxu1 %v1208_v7  ;;  %1085 = vmatprep.subr.bf16.mxu0 %v1209_v8  ;;  %v874_v8 = vlaneseq }
  0x3e   :  { %1107 = vmatprep.subr.bf16.mxu1 %v1210_v9 }
  0x40   :  { %1086 = vmatpush3.bf16.msra.mxu0 %v1211_v10  ;;  %v875_v10 = vand.u32 127, %v874_v8 }
  0x41   :  { %1108 = vmatpush3.bf16.msra.mxu1 %v1212_v11  ;;  %1124 = vmatprep.subr.bf16.mxu0 %v1229_v24  ;;  %v1016_v11 = vld [vmem:[%s1581_s4] ss:$0 sm:$0xff] }
  0x42   :  { %vm876_vm2 = vcmp.lt.s32.totalorder %v875_v10, 8 }
  0x43   :  { %690 = vmatmul.mubr.bf16.vlgmr.msra.gmra.mxu0 %v52_v21 }
  0x44   :  { %731 = vmatmul.mubr.bf16.vlgmr.msra.gmra.mxu1 %v54_v23  ;;  %1125 = vmatpush3.bf16.msra.mxu0 %v1213_v25 }
  0x45   :  { %1126 = vmatprep.subr.bf16.mxu0 %v1229_v24  ;;  %1140 = vmatprep.mubr.msk.bf16.mxu0 %vm1230_vm0, %v1229_v24 }
  0x48   :  { %1127 = vmatpush3.bf16.msra.mxu0 %v1214_v26 }
  0x49   :  { %1128 = vmatprep.subr.bf16.mxu0 %v1229_v24 }
  0x4c   :  { %1129 = vmatpush3.bf16.msra.mxu0 %v1215_v27 }
  0x4d   :  { %1130 = vmatprep.subr.bf16.mxu0 %v1229_v24 }
  0x50   :  { %1131 = vmatpush3.bf16.msra.mxu0 %v1216_v28 }
  0x51   :  { %1132 = vmatprep.subr.bf16.mxu0 %v1229_v24 }
  0x54   :  { %1133 = vmatpush3.bf16.msra.mxu0 %v1217_v29 }
  0x55   :  { %1134 = vmatprep.subr.bf16.mxu0 %v1229_v24 }
  0x58   :  { %1135 = vmatpush3.bf16.msra.mxu0 %v1218_v30 }
  0x59   :  { %1136 = vmatprep.subr.bf16.mxu0 %v1229_v24 }
  0x5c   :  { %1137 = vmatpush3.bf16.msra.mxu0 %v1219_v31 }
  0x5d   :  { %1138 = vmatprep.subr.bf16.mxu0 %v1229_v24 }
  0x60   :  { %1139 = vmatpush3.bf16.msra.mxu0 %v1220_v32 }
  0x9b   :  { %v903_v9 = vpop.permute.xlu1 %902 }
  0x9c   :  { %vm907_vm1 = vcmp.eq.s32.totalorder %v875_v10, %v903_v9 }
  0xa2   :  { %v906_v14 = vpop.permute.xlu1 %905 }
  0xa3   :  { %vm908_vm3 = vcmp.eq.s32.totalorder %v875_v10, %v906_v14 }
  0xe3   :  { %v1043_v36 = vpop.f32.mrf.mxu0 }
  0xe4   :  { %v1065_v37 = vpop.f32.mrf.mxu1 }
  0xe5   :  { %v1044_v38 = vpop.f32.mrf.mxu0 }
  0xe6   :  { %v1066_v39 = vpop.f32.mrf.mxu1  ;;  %v1045_v43 = vadd.f32 %v1044_v38, %v1043_v36 }
  0xe7   :  { %v1046_v40 = vpop.f32.mrf.mxu0  ;;  %v1067_v44 = vadd.f32 %v1066_v39, %v1065_v37 }
  0xe8   :  { %v1068_v41 = vpop.f32.mrf.mxu1 }
  0xe9   :  { %v1047_v42 = vpop.f32.mrf.mxu0  ;;  %v651_v49 = vadd.f32 %v1067_v44, %v1045_v43  ;;  %v1025_v43 = vsel %vm915_vm4, 1.0, %v1229_v24 }
  0xea   :  { %v1069_v45 = vpop.f32.mrf.mxu1  ;;  %v1048_v50 = vadd.f32 %v1047_v42, %v1046_v40 }
  0xeb   :  { %v1070_v51 = vadd.f32 %v1069_v45, %v1068_v41  ;;  %v1026_v45 = vsel %vm916_vm5, 1.0, %v1229_v24 }
  0xed   :  { %v654_v59 = vadd.f32 %v1070_v51, %v1048_v50 }
 0x103   :  { %v1087_v46 = vpop.f32.mrf.mxu0 }
 0x104   :  { %v1109_v47 = vpop.f32.mrf.mxu1 }
 0x105   :  { %v1088_v48 = vpop.f32.mrf.mxu0 }
 0x106   :  { %v1089_v52 = vadd.f32 %v1088_v48, %v1087_v46  ;;  %v1110_v53 = vpop.f32.mrf.mxu1 }
 0x107   :  { %v1090_v54 = vpop.f32.mrf.mxu0  ;;  %v1111_v56 = vadd.f32 %v1110_v53, %v1109_v47 }
 0x108   :  { %v692_v55 = vadd.f32 %v1089_v52, %v651_v49  ;;  %v1112_v57 = vpop.f32.mrf.mxu1 }
 0x109   :  { %v1091_v58 = vpop.f32.mrf.mxu0 }
 0x10a   :  { %v733_v60 = vadd.f32 %v1111_v56, %v692_v55  ;;  %v1092_v61 = vadd.f32 %v1091_v58, %v1090_v54  ;;  %v1113_v62 = vpop.f32.mrf.mxu1 }
 0x10b   :  { %v1114_v1 = vadd.f32 %v1113_v62, %v1112_v57 }
 0x10c   :  { %v695_v0 = vadd.f32 %v1092_v61, %v654_v59  ;;  %v755_v2 = vadd.f32 %v1015_v63, %v733_v60 }
 0x10e   :  { %v736_v3 = vadd.f32 %v1114_v1, %v695_v0  ;;  %v757_v5 = vmax.f32 %v755_v2, 0.0 }
 0x110   :  { %v756_v4 = vadd.f32 %v1015_v63, %v736_v3 }
 0x112   :  { %v758_v6 = vmax.f32 %v756_v4, 0.0 }
 0x114   :  { %v759_v7 = vpack.c.bf16 %v758_v6, %v757_v5 }
 0x116   :  { %1141 = vmatmul.mubr.bf16.vlgmr.msra.gmra.mxu0 %v759_v7 }
 0x1d6   :  { %v865_v12 = vpop.f32.mrf.mxu0 }
 0x1d7   :  { %v866_v13 = vadd.f32 %v1016_v11, %v865_v12 }
 0x1d8   :  { %v1142_v15 = vpop.f32.mrf.mxu0 }
 0x1d9   :  { %872 = vst [vmem:[%s1582_s6] sm:$0xff] %v866_v13  ;;  %v877_v16 = vsel %vm876_vm2, %v866_v13, -1e+30  ;;  %v909_v17 = vsel %vm907_vm1, %v866_v13, 0.0 }
 0x1da   :  { %879 = vmax.xlane.f32.xlu0 %v877_v16  ;;  %v868_v18 = vpop.f32.mrf.mxu0 }
 0x1db   :  { %v869_v19 = vadd.f32 %v1016_v11, %v868_v18 }
 0x1dc   :  { %v1143_v20 = vpop.f32.mrf.mxu0 }
 0x1dd   :  { %873 = vst [vmem:[%s1582_s6 + $0x8] sm:$0xff] %v869_v19  ;;  %v878_v21 = vsel %vm876_vm2, %v869_v19, -1e+30  ;;  %v910_v22 = vsel %vm908_vm3, %v869_v19, 0.0 }
 0x1de   :  { %881 = vmax.xlane.f32.xlu0 %v878_v21 }
 0x263   :  { %v880_v23 = vpop.xlane.xlu0 %879 }
 0x264   :  { %v883_v25 = vsub.f32 %v877_v16, %v880_v23 }
 0x266   :  { %v885_v26 = vmul.f32 1.442695, %v883_v25 }
 0x267   :  { %v882_v27 = vpop.xlane.xlu0 %881 }
 0x268   :  { %1221 = vpow2.f32 %v885_v26  ;;  %v884_v28 = vsub.f32 %v878_v21, %v882_v27 }
 0x26a   :  { %v887_v29 = vmul.f32 1.442695, %v884_v28 }
 0x26c   :  { %1223 = vpow2.f32 %v887_v29 }
 0x275   :  { %v1222_v30 = vpop.eup %1221 }
 0x276   :  { %889 = vadd.xlane.f32.xlu0 %v1222_v30 }
 0x279   :  { %v1224_v31 = vpop.eup %1223 }
 0x27a   :  { %911 = vadd.xlane.f32.xlu0 %v909_v17  ;;  %891 = vadd.xlane.f32.xlu1 %v1224_v31 }
 0x27e   :  { %913 = vadd.xlane.f32.xlu0 %v910_v22 }
 0x2ff   :  { %v890_v32 = vpop.xlane.xlu0 %889 }
 0x300   :  { %1225 = vlog2.f32 %v890_v32 }
 0x303   :  { %v892_v33 = vpop.xlane.xlu1 %891  ;;  %v912_v38 = vpop.xlane.xlu0 %911 }
 0x304   :  { %1227 = vlog2.f32 %v892_v33 }
 0x307   :  { %v914_v46 = vpop.xlane.xlu0 %913 }
 0x30d   :  { %v1226_v36 = vpop.eup %1225 }
 0x30e   :  { %v894_v37 = vmul.f32 0.6931472, %v1226_v36 }
 0x310   :  { %v897_v39 = vadd.f32 %v894_v37, %v880_v23 }
 0x311   :  { %v1228_v40 = vpop.eup %1227 }
 0x312   :  { %v896_v41 = vmul.f32 0.6931472, %v1228_v40  ;;  %v921_v42 = vsub.f32 %v897_v39, %v912_v38 }
 0x314   :  { %v898_v44 = vadd.f32 %v896_v41, %v882_v27  ;;  %v923_v47 = vmul.f32 %v1025_v43, %v921_v42 }
 0x316   :  { %v922_v48 = vsub.f32 %v898_v44, %v914_v46  ;;  %v926_v50 = vsel %vm925_vm6, %v923_v47, 0.0 }
 0x318   :  { %v924_v49 = vmul.f32 %v1026_v45, %v922_v48 }
 0x31a   :  { %v927_v51 = vsel %vm925_vm6, %v924_v49, 0.0 }
 0x31b   :  { %v928_v52 = vadd.f32 %v927_v51, %v926_v50 }
 0x31d   :  { %v929_v34 = vrot.slane %v928_v52, 4 }
 0x31f   :  { %v930_v53 = vadd.f32 %v929_v34, %v928_v52 }
 0x321   :  { %v931_v54 = vrot.slane %v930_v53, 2 }
 0x323   :  { %v932_v55 = vadd.f32 %v931_v54, %v930_v53 }
 0x325   :  { %v933_v35 = vrot.slane %v932_v55, 1 }
 0x327   :  { %v934_v56 = vadd.f32 %v933_v35, %v932_v55 }
 0x329   :  { %937 = vperm.xlu0 %1148, %v934_v56  }
 0x3a4   :  { %v938_v57 = vpop.permute.xlu0 %937 }
 0x3a5   :  { %940 = vst [vmem:[%s1583_s7] sm:$0xff] %v938_v57 }

</bundles_post_ra>
